<compile_context>
chip_gen: v5e
topology: v5e:2x2
jax: 0.10.0
libtpu: 0.0.40
codegen_flags: <defaults>
</compile_context>

<pallas_src>
import functools

import jax
import jax.numpy as jnp
from jax import lax
from jax.experimental import pallas as pl
from jax.experimental.pallas import tpu as pltpu


def _ceil_to(x, m):
    return ((x + m - 1) // m) * m


def _pad2(a, rows, cols):
    return jnp.pad(a, ((0, rows - a.shape[0]), (0, cols - a.shape[1])))


def gcn_layer_kernel(tmap_ref, tcnt_ref, adj_ref, xs_ref, xd_ref, ndst_ref,
                     w_ref, b_ref, wres_ref, bres_ref, out_ref, acc_ref,
                     *, tk, xs_resident):
    """Block-sparse GCN layer: aggregate nonzero src tiles -> project -> relu -> + residual."""
    i = pl.program_id(0)
    j = pl.program_id(1)
    n_j = pl.num_programs(1)

    @pl.when(j == 0)
    def _():
        acc_ref[...] = jnp.zeros_like(acc_ref)

    # Only the first tcnt[i] steps along j carry a distinct nonzero adjacency
    # tile; beyond that the index_map repeats the previous tile (no new DMA),
    # and the MXU work is skipped here.
    @pl.when(j < tcnt_ref[i])
    def _():
        adj = adj_ref[...].astype(jnp.bfloat16)        # int8 0/1 -> bf16 (VPU, free filler)
        if xs_resident:
            src_tile = tmap_ref[i * n_j + j]
            src0 = pl.multiple_of(src_tile * tk, tk)
            xs = xs_ref[pl.ds(src0, tk), :]
        else:
            xs = xs_ref[...]
        # acc[dst, fin] += sum_src adj[src, dst] * xs[src, fin]  (A^T X, transposed-LHS feed)
        acc_ref[...] += lax.dot_general(
            adj, xs, (((0,), (0,)), ((), ())),
            preferred_element_type=jnp.float32)

    @pl.when(j == n_j - 1)
    def _():
        # dst-side normalization applied once to the f32 accumulator.
        agg = (acc_ref[...] * ndst_ref[...]).astype(jnp.bfloat16)
        h = jnp.dot(agg, w_ref[...], preferred_element_type=jnp.float32)
        h = jnp.maximum(h + b_ref[...], 0.0)
        # Residual branch: relu(Linear(x_dst)).
        res = jnp.dot(xd_ref[...], wres_ref[...],
                      preferred_element_type=jnp.float32)
        res = jnp.maximum(res + bres_ref[...], 0.0)
        out_ref[...] = (h + res).astype(out_ref.dtype)


def gcn_layer_pallas(adj, x, w, b, w_res, b_res, *, tm=512, tk=2048,
                     xs_resident_bytes=8 * 1024 * 1024):
    """adj[src, dst] = 1 iff edge src -> dst (binary, un-normalized); x is [N, Fin]."""
    n, fin = x.shape
    fout = w.shape[1]

    # --- padded / tiled sizes (lane-dense feature dims, tile-divisible N). ---
    fin_p = _ceil_to(fin, 128)
    fout_p = _ceil_to(fout, 128)
    n128 = _ceil_to(n, 128)

    tm = min(tm, n128)
    # Keep >= 2 dst tiles when possible so the "parallel" axis can split across
    # v7x's two TensorCores.
    if n128 >= 256 and n128 // tm < 2:
        tm = max(128, (n128 // 2) // 128 * 128)
    tk = min(tk, n128)

    n_dst = _ceil_to(n128, tm)
    n_src = _ceil_to(n128, tk)
    n_dst_t = n_dst // tm
    n_src_t = n_src // tk

    # --- single pass over the f32 adjacency: cast to int8 (binary) + pad. ---
    adj_i8 = _pad2(adj.astype(jnp.int8), n_src, n_dst)      # [src, dst], un-transposed

    # DGL GraphConv norm='both' degree factors (clamped >= 1), from the int8 copy.
    deg_out = adj_i8.sum(axis=1, dtype=jnp.int32)[:n].astype(jnp.float32)  # per-src
    deg_in = adj_i8.sum(axis=0, dtype=jnp.int32)[:n].astype(jnp.float32)   # per-dst
    norm_src = jnp.maximum(deg_out, 1.0) ** -0.5
    norm_dst = jnp.maximum(deg_in, 1.0) ** -0.5

    # bf16 MXU inputs (f32 accumulation inside the kernel), zero padding.
    xs_p = _pad2(x * norm_src[:, None], n_src, fin_p).astype(jnp.bfloat16)  # src-scaled feats
    xd_p = _pad2(x, n_dst, fin_p).astype(jnp.bfloat16)                      # raw feats (residual)
    ndst_p = _pad2(norm_dst[:, None], n_dst, 1).astype(jnp.float32)
    w_p = _pad2(w, fin_p, fout_p).astype(jnp.bfloat16)
    b_p = _pad2(b.reshape(1, -1), 1, fout_p).astype(jnp.float32)
    wr_p = _pad2(w_res, fin_p, fout_p).astype(jnp.bfloat16)
    br_p = _pad2(b_res.reshape(1, -1), 1, fout_p).astype(jnp.float32)

    # --- block-sparse schedule: per dst tile, nonzero src tiles first, then the
    #     last nonzero index repeated (repeat => no DMA, compute skipped). ---
    blk = adj_i8.reshape(n_src_t, tk, n_dst_t, tm).sum(axis=(1, 3), dtype=jnp.int32)
    nz = (blk > 0).T                                           # [n_dst_t, n_src_t]
    tile_cnt = nz.sum(axis=1).astype(jnp.int32)                # nonzero tiles per dst tile
    src_ids = jnp.arange(n_src_t, dtype=jnp.int32)[None, :]
    order = jnp.argsort(jnp.where(nz, src_ids, src_ids + n_src_t), axis=1)
    j_ids = jnp.arange(n_src_t, dtype=jnp.int32)[None, :]
    j_clamped = jnp.minimum(j_ids, jnp.maximum(tile_cnt - 1, 0)[:, None])
    tile_map = jnp.take_along_axis(order, j_clamped, axis=1).astype(jnp.int32)
    tile_map = tile_map.reshape(-1)                            # flat SMEM table [n_dst_t*n_src_t]

    # --- VMEM budget (double-buffered) + residency decision for xs. ---
    xs_bytes = n_src * fin_p * 2
    xs_resident = xs_bytes <= xs_resident_bytes
    ws = (2 * tk * tm                                          # adj (int8)
          + (2 * xs_bytes if xs_resident else 2 * tk * fin_p * 2)
          + 2 * tm * fin_p * 2                                 # xd
          + 2 * tm * 4                                         # norm_dst
          + 4 * fin_p * fout_p * 2 + 4 * fout_p * 4            # weights + biases
          + 2 * tm * fout_p * 2                                # output tile
          + tm * fin_p * 4)                                    # f32 accumulator
    vmem_limit = int(min(48 * 1024 * 1024, max(32 * 1024 * 1024, ws + (8 << 20))))

    if xs_resident:
        xs_spec = pl.BlockSpec((n_src, fin_p), lambda i, j, tmap, tcnt: (0, 0))
    else:
        xs_spec = pl.BlockSpec(
            (tk, fin_p), lambda i, j, tmap, tcnt: (tmap[i * n_src_t + j], 0))

    out = pl.pallas_call(
        functools.partial(gcn_layer_kernel, tk=tk, xs_resident=xs_resident),
        out_shape=jax.ShapeDtypeStruct((n_dst, fout_p), jnp.bfloat16),
        grid_spec=pltpu.PrefetchScalarGridSpec(
            num_scalar_prefetch=2,
            grid=(n_dst_t, n_src_t),
            in_specs=[
                # adjacency tile [src_tile, dst_tile], data-dependent src index
                pl.BlockSpec((tk, tm),
                             lambda i, j, tmap, tcnt: (tmap[i * n_src_t + j], i)),
                xs_spec,                                               # norm_src-scaled x
                pl.BlockSpec((tm, fin_p), lambda i, j, tmap, tcnt: (i, 0)),   # raw x (residual)
                pl.BlockSpec((tm, 1), lambda i, j, tmap, tcnt: (i, 0)),       # norm_dst
                pl.BlockSpec((fin_p, fout_p), lambda i, j, tmap, tcnt: (0, 0)),  # W
                pl.BlockSpec((1, fout_p), lambda i, j, tmap, tcnt: (0, 0)),      # b
                pl.BlockSpec((fin_p, fout_p), lambda i, j, tmap, tcnt: (0, 0)),  # W_res
                pl.BlockSpec((1, fout_p), lambda i, j, tmap, tcnt: (0, 0)),      # b_res
            ],
            out_specs=pl.BlockSpec((tm, fout_p), lambda i, j, tmap, tcnt: (i, 0)),
            scratch_shapes=[pltpu.VMEM((tm, fin_p), jnp.float32)],
        ),
        compiler_params=pltpu.CompilerParams(
            dimension_semantics=("parallel", "arbitrary"),
            vmem_limit_bytes=vmem_limit),
    )(tile_map, tile_cnt, adj_i8, xs_p, xd_p, ndst_p, w_p, b_p, wr_p, br_p)

    return out[:n, :fout]


def reference_jax(adj, x, w, b, w_res, b_res):
    """Pure-JAX reference mimicking the kernel's bf16 quantization points."""
    bf = lambda a: a.astype(jnp.bfloat16).astype(jnp.float32)
    out_deg = jnp.maximum(adj.sum(axis=1), 1.0)
    in_deg = jnp.maximum(adj.sum(axis=0), 1.0)
    norm_src = out_deg ** -0.5
    norm_dst = in_deg ** -0.5
    agg = adj.T @ bf(x * norm_src[:, None])
    agg = bf(agg * norm_dst[:, None])
    h = jnp.maximum(agg @ bf(w) + b, 0.0)
    res = jnp.maximum(bf(x) @ bf(w_res) + b_res, 0.0)
    return h + res


if __name__ == "__main__":
    key = jax.random.PRNGKey(0)
    k_adj, k_x, k_w, k_b, k_wr, k_br, k_sub, k_x2 = jax.random.split(key, 8)

    N = 200           # number of nodes
    IN_FEATS = 32     # input_size
    OUT_FEATS = 64    # output_size

    # Random directed graph (dense binary adjacency, src -> dst), deterministic.
    adj = (jax.random.uniform(k_adj, (N, N)) < 0.1).astype(jnp.float32)
    x = jax.random.normal(k_x, (N, IN_FEATS), dtype=jnp.float32)

    # GraphConv weight [in, out] and bias.
    w = jax.random.normal(k_w, (IN_FEATS, OUT_FEATS), dtype=jnp.float32) * (
        2.0 / (IN_FEATS + OUT_FEATS)) ** 0.5
    b = jax.random.normal(k_b, (1, OUT_FEATS), dtype=jnp.float32) * 0.01

    # Residual nn.Linear(input_size, output_size), stored transposed to [in, out].
    w_res = jax.random.normal(k_wr, (IN_FEATS, OUT_FEATS), dtype=jnp.float32) * (
        1.0 / IN_FEATS) ** 0.5
    b_res = jax.random.normal(k_br, (1, OUT_FEATS), dtype=jnp.float32) * 0.01

    # --- Test 1: dense-ish graph, resident-xs path, multi-tile grid. ---
    out = gcn_layer_pallas(adj, x, w, b, w_res, b_res, tm=128, tk=128)
    out = jax.block_until_ready(out)
    ref = reference_jax(adj, x, w, b, w_res, b_res)
    assert out.shape == (N, OUT_FEATS)
    err = float(jnp.max(jnp.abs(out.astype(jnp.float32) - ref)))
    assert jnp.allclose(out.astype(jnp.float32), ref, atol=2e-2, rtol=2e-2), err

    # --- Test 2: block-structured sparse graph (empty tiles get skipped) with
    #     the streamed-xs path forced (xs_resident_bytes=0). ---
    N2 = 300
    sub = (jax.random.uniform(k_sub, (96, 96)) < 0.2).astype(jnp.float32)
    adj2 = jnp.zeros((N2, N2), dtype=jnp.float32).at[:96, :96].set(sub)
    x2 = jax.random.normal(k_x2, (N2, IN_FEATS), dtype=jnp.float32)
    out2 = gcn_layer_pallas(adj2, x2, w, b, w_res, b_res, tm=128, tk=128,
                            xs_resident_bytes=0)
    out2 = jax.block_until_ready(out2)
    ref2 = reference_jax(adj2, x2, w, b, w_res, b_res)
    assert out2.shape == (N2, OUT_FEATS)
    err2 = float(jnp.max(jnp.abs(out2.astype(jnp.float32) - ref2)))
    assert jnp.allclose(out2.astype(jnp.float32), ref2, atol=2e-2, rtol=2e-2), err2

    print("KERNEL_OK")
</pallas_src>

<mosaic_0001>
module attributes {stable_mosaic.version = 11 : i64} {
  func.func @gcn_layer_kernel(%arg0: i32, %arg1: i32, %arg2: memref<4xi32, #tpu.memory_space<smem>>, %arg3: memref<2xi32, #tpu.memory_space<smem>>, %arg4: memref<128x128xi8, #tpu.memory_space<vmem>>, %arg5: memref<256x128xbf16, #tpu.memory_space<vmem>>, %arg6: memref<128x128xbf16, #tpu.memory_space<vmem>>, %arg7: memref<128x1xf32, #tpu.memory_space<vmem>>, %arg8: memref<128x128xbf16, #tpu.memory_space<vmem>>, %arg9: memref<1x128xf32, #tpu.memory_space<vmem>>, %arg10: memref<128x128xbf16, #tpu.memory_space<vmem>>, %arg11: memref<1x128xf32, #tpu.memory_space<vmem>>, %arg12: memref<128x128xbf16, #tpu.memory_space<vmem>>, %arg13: memref<128x128xf32, #tpu.memory_space<vmem>>) attributes {dimension_semantics = [#tpu.dimension_semantics<parallel>, #tpu.dimension_semantics<arbitrary>], iteration_bounds = array<i64: 2, 2>, scalar_prefetch = 2 : i64, scratch_operands = 1 : i64, tpu.core_type = #tpu.core_type<tc>, window_params = [{transform_indices = @transform_0, window_bounds = array<i64: 128, 128>}, {pipeline_mode = #tpu.pipeline_mode<synchronous>, transform_indices = @transform_1, window_bounds = array<i64: 256, 128>}, {transform_indices = @transform_2, window_bounds = array<i64: 128, 128>}, {transform_indices = @transform_3, window_bounds = array<i64: 128, 1>}, {pipeline_mode = #tpu.pipeline_mode<synchronous>, transform_indices = @transform_4, window_bounds = array<i64: 128, 128>}, {pipeline_mode = #tpu.pipeline_mode<synchronous>, transform_indices = @transform_5, window_bounds = array<i64: 1, 128>}, {pipeline_mode = #tpu.pipeline_mode<synchronous>, transform_indices = @transform_6, window_bounds = array<i64: 128, 128>}, {pipeline_mode = #tpu.pipeline_mode<synchronous>, transform_indices = @transform_7, window_bounds = array<i64: 1, 128>}, {transform_indices = @transform_8, window_bounds = array<i64: 128, 128>}]} {
    %c0_i32 = arith.constant 0 : i32
    %0 = arith.cmpi eq, %arg1, %c0_i32 : i32
    %1 = arith.extui %0 : i1 to i32
    %c0_i32_0 = arith.constant 0 : i32
    %2 = arith.cmpi ne, %1, %c0_i32_0 : i32
    scf.if %2 {
      %cst = arith.constant 0.000000e+00 : f32
      %11 = vector.broadcast %cst : f32 to vector<128x128xf32>
      %c0 = arith.constant 0 : index
      %c0_3 = arith.constant 0 : index
      %12 = vector.load %arg13[%c0, %c0_3] : memref<128x128xf32, #tpu.memory_space<vmem>>, vector<128x128xf32>
      tpu.vector_store %arg13[%c0, %c0_3], %11 {strides = array<i32>} : memref<128x128xf32, #tpu.memory_space<vmem>>, vector<128x128xf32>,
    } else {
    }
    %3 = arith.index_cast %arg0 : i32 to index
    %4 = memref.load %arg3[%3] : memref<2xi32, #tpu.memory_space<smem>>
    %5 = arith.cmpi slt, %arg1, %4 : i32
    %6 = arith.extui %5 : i1 to i32
    %c0_i32_1 = arith.constant 0 : i32
    %7 = arith.cmpi ne, %6, %c0_i32_1 : i32
    scf.if %7 {
      %c0 = arith.constant 0 : index
      %c0_3 = arith.constant 0 : index
      %11 = vector.load %arg4[%c0, %c0_3] : memref<128x128xi8, #tpu.memory_space<vmem>>, vector<128x128xi8>
      %12 = arith.sitofp %11 : vector<128x128xi8> to vector<128x128xbf16>
      %c2_i32 = arith.constant 2 : i32
      %13 = arith.muli %arg0, %c2_i32 : i32
      %14 = arith.addi %13, %arg1 : i32
      %15 = arith.index_cast %14 : i32 to index
      %16 = memref.load %arg2[%15] : memref<4xi32, #tpu.memory_space<smem>>
      %c128_i32 = arith.constant 128 : i32
      %17 = arith.muli %16, %c128_i32 : i32
      %18 = tpu.assume_multiple %17, 128 : i32
      %19 = arith.index_cast %18 : i32 to index
      %c0_4 = arith.constant 0 : index
      %20 = vector.load %arg5[%19, %c0_4] : memref<256x128xbf16, #tpu.memory_space<vmem>>, vector<128x128xbf16>
      %c0_5 = arith.constant 0 : index
      %c0_6 = arith.constant 0 : index
      %21 = vector.load %arg13[%c0_5, %c0_6] : memref<128x128xf32, #tpu.memory_space<vmem>>, vector<128x128xf32>
      %cst = arith.constant dense<0.000000e+00> : vector<128x128xf32>
      %22 = tpu.matmul %12, %20, %cst {dimension_numbers = #tpu.dot_dimension_numbers<[0], [0], [1], [1], [0, 1, 1, 1], [], []>} : vector<128x128xbf16>, vector<128x128xbf16>, vector<128x128xf32> -> vector<128x128xf32>
      %23 = arith.addf %21, %22 : vector<128x128xf32>
      %c0_7 = arith.constant 0 : index
      %c0_8 = arith.constant 0 : index
      %24 = vector.load %arg13[%c0_7, %c0_8] : memref<128x128xf32, #tpu.memory_space<vmem>>, vector<128x128xf32>
      tpu.vector_store %arg13[%c0_7, %c0_8], %23 {strides = array<i32>} : memref<128x128xf32, #tpu.memory_space<vmem>>, vector<128x128xf32>,
    } else {
    }
    %c1_i32 = arith.constant 1 : i32
    %8 = arith.cmpi eq, %arg1, %c1_i32 : i32
    %9 = arith.extui %8 : i1 to i32
    %c0_i32_2 = arith.constant 0 : i32
    %10 = arith.cmpi ne, %9, %c0_i32_2 : i32
    scf.if %10 {
      %c0 = arith.constant 0 : index
      %c0_3 = arith.constant 0 : index
      %11 = vector.load %arg13[%c0, %c0_3] : memref<128x128xf32, #tpu.memory_space<vmem>>, vector<128x128xf32>
      %c0_4 = arith.constant 0 : index
      %c0_5 = arith.constant 0 : index
      %12 = vector.load %arg7[%c0_4, %c0_5] : memref<128x1xf32, #tpu.memory_space<vmem>>, vector<128x1xf32>
      %13 = vector.broadcast %12 : vector<128x1xf32> to vector<128x128xf32>
      %14 = arith.mulf %11, %13 : vector<128x128xf32>
      %15 = arith.truncf %14 : vector<128x128xf32> to vector<128x128xbf16>
      %c0_6 = arith.constant 0 : index
      %c0_7 = arith.constant 0 : index
      %16 = vector.load %arg8[%c0_6, %c0_7] : memref<128x128xbf16, #tpu.memory_space<vmem>>, vector<128x128xbf16>
      %cst = arith.constant dense<0.000000e+00> : vector<128x128xf32>
      %17 = tpu.matmul %15, %16, %cst {dimension_numbers = #tpu.dot_dimension_numbers<[1], [0], [0], [1], [0, 0, 1, 1], [], []>} : vector<128x128xbf16>, vector<128x128xbf16>, vector<128x128xf32> -> vector<128x128xf32>
      %c0_8 = arith.constant 0 : index
      %c0_9 = arith.constant 0 : index
      %18 = vector.load %arg9[%c0_8, %c0_9] : memref<1x128xf32, #tpu.memory_space<vmem>>, vector<1x128xf32>
      %19 = vector.broadcast %18 : vector<1x128xf32> to vector<128x128xf32>
      %20 = arith.addf %17, %19 : vector<128x128xf32>
      %cst_10 = arith.constant 0.000000e+00 : f32
      %21 = vector.broadcast %cst_10 : f32 to vector<128x128xf32>
      %22 = arith.maximumf %20, %21 : vector<128x128xf32>
      %c0_11 = arith.constant 0 : index
      %c0_12 = arith.constant 0 : index
      %23 = vector.load %arg6[%c0_11, %c0_12] : memref<128x128xbf16, #tpu.memory_space<vmem>>, vector<128x128xbf16>
      %c0_13 = arith.constant 0 : index
      %c0_14 = arith.constant 0 : index
      %24 = vector.load %arg10[%c0_13, %c0_14] : memref<128x128xbf16, #tpu.memory_space<vmem>>, vector<128x128xbf16>
      %cst_15 = arith.constant dense<0.000000e+00> : vector<128x128xf32>
      %25 = tpu.matmul %23, %24, %cst_15 {dimension_numbers = #tpu.dot_dimension_numbers<[1], [0], [0], [1], [0, 0, 1, 1], [], []>} : vector<128x128xbf16>, vector<128x128xbf16>, vector<128x128xf32> -> vector<128x128xf32>
      %c0_16 = arith.constant 0 : index
      %c0_17 = arith.constant 0 : index
      %26 = vector.load %arg11[%c0_16, %c0_17] : memref<1x128xf32, #tpu.memory_space<vmem>>, vector<1x128xf32>
      %27 = vector.broadcast %26 : vector<1x128xf32> to vector<128x128xf32>
      %28 = arith.addf %25, %27 : vector<128x128xf32>
      %cst_18 = arith.constant 0.000000e+00 : f32
      %29 = vector.broadcast %cst_18 : f32 to vector<128x128xf32>
      %30 = arith.maximumf %28, %29 : vector<128x128xf32>
      %31 = arith.addf %22, %30 : vector<128x128xf32>
      %32 = arith.truncf %31 : vector<128x128xf32> to vector<128x128xbf16>
      %c0_19 = arith.constant 0 : index
      %c0_20 = arith.constant 0 : index
      %33 = vector.load %arg12[%c0_19, %c0_20] : memref<128x128xbf16, #tpu.memory_space<vmem>>, vector<128x128xbf16>
      tpu.vector_store %arg12[%c0_19, %c0_20], %32 {strides = array<i32>} : memref<128x128xbf16, #tpu.memory_space<vmem>>, vector<128x128xbf16>,
    } else {
    }
    return
  }
  func.func @transform_0(%arg0: i32, %arg1: i32, %arg2: memref<4xi32, #tpu.memory_space<smem>>, %arg3: memref<2xi32, #tpu.memory_space<smem>>) -> (i32, i32) {
    %c2_i32 = arith.constant 2 : i32
    %0 = arith.muli %arg0, %c2_i32 : i32
    %1 = arith.addi %0, %arg1 : i32
    %2 = arith.index_cast %1 : i32 to index
    %3 = memref.load %arg2[%2] : memref<4xi32, #tpu.memory_space<smem>>
    %c0_i32 = arith.constant 0 : i32
    return %3, %arg0 : i32, i32
  }
  func.func @transform_1(%arg0: i32, %arg1: i32, %arg2: memref<4xi32, #tpu.memory_space<smem>>, %arg3: memref<2xi32, #tpu.memory_space<smem>>) -> (i32, i32) {
    %c0_i32 = arith.constant 0 : i32
    %c0_i32_0 = arith.constant 0 : i32
    %c0_i32_1 = arith.constant 0 : i32
    return %c0_i32, %c0_i32_0 : i32, i32
  }
  func.func @transform_2(%arg0: i32, %arg1: i32, %arg2: memref<4xi32, #tpu.memory_space<smem>>, %arg3: memref<2xi32, #tpu.memory_space<smem>>) -> (i32, i32) {
    %c0_i32 = arith.constant 0 : i32
    %c0_i32_0 = arith.constant 0 : i32
    return %arg0, %c0_i32 : i32, i32
  }
  func.func @transform_3(%arg0: i32, %arg1: i32, %arg2: memref<4xi32, #tpu.memory_space<smem>>, %arg3: memref<2xi32, #tpu.memory_space<smem>>) -> (i32, i32) {
    %c0_i32 = arith.constant 0 : i32
    %c0_i32_0 = arith.constant 0 : i32
    return %arg0, %c0_i32 : i32, i32
  }
  func.func @transform_4(%arg0: i32, %arg1: i32, %arg2: memref<4xi32, #tpu.memory_space<smem>>, %arg3: memref<2xi32, #tpu.memory_space<smem>>) -> (i32, i32) {
    %c0_i32 = arith.constant 0 : i32
    %c0_i32_0 = arith.constant 0 : i32
    %c0_i32_1 = arith.constant 0 : i32
    return %c0_i32, %c0_i32_0 : i32, i32
  }
  func.func @transform_5(%arg0: i32, %arg1: i32, %arg2: memref<4xi32, #tpu.memory_space<smem>>, %arg3: memref<2xi32, #tpu.memory_space<smem>>) -> (i32, i32) {
    %c0_i32 = arith.constant 0 : i32
    %c0_i32_0 = arith.constant 0 : i32
    %c0_i32_1 = arith.constant 0 : i32
    return %c0_i32, %c0_i32_0 : i32, i32
  }
  func.func @transform_6(%arg0: i32, %arg1: i32, %arg2: memref<4xi32, #tpu.memory_space<smem>>, %arg3: memref<2xi32, #tpu.memory_space<smem>>) -> (i32, i32) {
    %c0_i32 = arith.constant 0 : i32
    %c0_i32_0 = arith.constant 0 : i32
    %c0_i32_1 = arith.constant 0 : i32
    return %c0_i32, %c0_i32_0 : i32, i32
  }
  func.func @transform_7(%arg0: i32, %arg1: i32, %arg2: memref<4xi32, #tpu.memory_space<smem>>, %arg3: memref<2xi32, #tpu.memory_space<smem>>) -> (i32, i32) {
    %c0_i32 = arith.constant 0 : i32
    %c0_i32_0 = arith.constant 0 : i32
    %c0_i32_1 = arith.constant 0 : i32
    return %c0_i32, %c0_i32_0 : i32, i32
  }
  func.func @transform_8(%arg0: i32, %arg1: i32, %arg2: memref<4xi32, #tpu.memory_space<smem>>, %arg3: memref<2xi32, #tpu.memory_space<smem>>) -> (i32, i32) {
    %c0_i32 = arith.constant 0 : i32
    %c0_i32_0 = arith.constant 0 : i32
    return %arg0, %c0_i32 : i32, i32
  }
}

</mosaic_0001>

<bundles_post_ra>
// kernel: tpu_custom_call.1
= control target key start
LH: loop header
LB: loop body
LE: loop exit
PB: predicated region body
PF: predicated region fallthrough
CT: control target
= control target key end

     0   :  { %s2064_s19 = smov [#allocation4]   ;;  %s2065_s20 = smov [#allocation5]   ;;  %s2461_s0 = inlined_call_operand.vmem [shape: s32[4], index: 0, kind: input, shape index: {}]   ;;  %s2462_s2 = inlined_call_operand.vmem [shape: s8[256,256], index: 2, kind: input, shape index: {}]   ;;  %s2463_s3 = inlined_call_operand.vmem [shape: bf16[256,128], index: 3, kind: input, shape index: {}]   ;;  %s2464_s4 = inlined_call_operand.hbm [shape: bf16[256,128], index: 4, kind: input, shape index: {}]   ;;  %s2465_s5 = inlined_call_operand.vmem [shape: f32[256,1], index: 5, kind: input, shape index: {}]   ;;  %s2466_s6 = inlined_call_operand.hbm [shape: bf16[128,128], index: 6, kind: input, shape index: {}]   ;;  %s2467_s7 = inlined_call_operand.vmem [shape: f32[1,128], index: 7, kind: input, shape index: {}]   ;;  %s2468_s8 = inlined_call_operand.hbm [shape: bf16[128,128], index: 8, kind: input, shape index: {}]   ;;  %s2469_s9 = inlined_call_operand.vmem [shape: f32[1,128], index: 9, kind: input, shape index: {}]   ;;  %s2470_s10 = inlined_call_operand.hbm [shape: bf16[256,128], index: 10, kind: output, shape index: {}]   ;;  %s2471_s1 = inlined_call_operand.vmem [shape: s32[2], index: 1, kind: input, shape index: {}]  }
   0x1   :  { %2480 = sst [smem:[#allocation25_spill]] %s2463_s3  ;;  %s16_s15 = sshll.u32 %s2461_s0, 4  ;;  %s17_s15 = int_to_ptr.vmem [resolvable:$true] %s16_s15 }
   0x2   :  { %2481 = sst [smem:[#allocation26_spill]] %s2466_s6  ;;  %s21_s18 = sshll.u32 %s2471_s1, 4  ;;  %s22_s18 = int_to_ptr.vmem [resolvable:$true] %s21_s18 }
   0x3   :  { %2482 = sst [smem:[#allocation27_spill]] %s2467_s7 }
   0x4   :  { %2483 = sst [smem:[#allocation28_spill]] %s2468_s8 }
   0x5   :  { %2484 = sst [smem:[#allocation29_spill]] %s2469_s9 }
   0x6   :  { %2485 = sst [smem:[#allocation30_spill]] %s2470_s10 }
   0x7   :  { %19 = dma.vmem_to_smem %s17_s15, 16, %s2064_s19, [#allocation3] }
   0x8   :  { %24 = dma.vmem_to_smem %s22_s18, 16, %s2065_s20, [#allocation3] }
   0x9   :  { %2010 = dma.done.wait [#allocation3], 32 }
   0xa   :  { %2011 = vsyncadd [#allocation3], 4294967264 }
   0xb   :  { %27 = sfence }
   0xc   :  { %28 = vsyncpa [#allocation8], 0 }
   0xd   :  { %30 = vsyncpa [#allocation8 + $0x1], 0 }
   0xe   :  { %31 = vsyncpa [#allocation11], 0 }
   0xf   :  { %32 = vsyncpa [#allocation9], 0 }
  0x10   :  { %34 = vsyncpa [#allocation9 + $0x1], 0  ;;  %s2137_s21 = smov 0   ;;  %s2139_s0 = smov 0  }
  0x11   :  { %s2141_s22 = smov 0   ;;  %s2143_s1 = smov 0  }
  0x12   :  { %s2145_s23 = smov 0   ;;  %s2147_s24 = smov 0  }
  0x13   :  { %s2149_s25 = smov 0   ;;  %s2151_s26 = smov 0  }
  0x14   :  { %s2153_s27 = smov 0   ;;  %s2155_s28 = smov 0  }
  0x15 LB: > { %2486 = sst [smem:[#allocation18_spill]] %s2026_s21  ;;  %s1420_s29 = sadd.s32 4294967295, %s2062_s28   ;;  %s2062_s28 = sphi %s2155_s28, %s40_s28   ;;  %s2058_s27 = sphi %s2153_s27, %s2520_s27   ;;  %s2054_s26 = sphi %s2151_s26, %s2512_s26   ;;  %s2050_s25 = sphi %s2149_s25, %s2519_s25   ;;  %s2046_s24 = sphi %s2147_s24, %s2511_s24   ;;  %s2042_s23 = sphi %s2145_s23, %s2518_s23   ;;  %s2038_s1 = sphi %s2143_s1, %s2517_s1   ;;  %s2034_s22 = sphi %s2141_s22, %s2516_s22   ;;  %s2030_s0 = sphi %s2139_s0, %s2515_s0   ;;  %s2026_s21 = sphi %s2137_s21, %s2514_s21  }
  0x16   : > { %2487 = sst [smem:[#allocation19_spill]] %s2054_s26  ;;  %s1421_s30 = sadd.s32 4294967294, %s2062_s28  }
  0x17   : > { %s49_s11 = sadd.s32 1, %s2054_s26  ;;  %s52_s12 = sadd.s32 1, %s2058_s27 }
  0x18   : > { %p50_p0 = scmp.ge.s32.totalorder %s49_s11, 2  ;;  %s1422_s13 = sshll.u32 %s2058_s27, 1 }
  0x19   : > { %s2193_s14 = sadd.s32 %s2054_s26, %s1422_s13  ;;  %p74_p1 = scmp.ne.s32.totalorder %s2042_s23, %s2038_s1 }
  0x1a   : > { %s2522_s11 = smov (%p50_p0, %s49_s11), 0  ;;  %s2524_s12 = smov (!%p50_p0, %s52_s12), %s2058_s27 }
  0x1b   : > { %2488 = sst [smem:[#allocation20_spill]] %s2522_s11  ;;  %p54_p2 = scmp.ge.s32.totalorder %s2524_s12, 2 }
  0x1c   : > { %s58_s16 = sld [smem:[#allocation4 + %s2193_s14]]  ;;  %p75_p3 = scmp.eq.s32.totalorder %s2062_s28, 0 }
  0x1d   : > { %s114_s17 = sadd.s32 1, %s2034_s22  ;;  %p121_p4 = scmp.ne.s32.totalorder %s2034_s22, %s2030_s0 }
  0x1e   : > { %s2526_s12 = smov (%p54_p2, %s2524_s12), 0  ;;  %p2208_p5 = por %p75_p3, %p74_p1 }
  0x1f   : > { %2489 = sst [smem:[#allocation21_spill]] %s2526_s12  ;;  %p2215_p6 = por %p121_p4, %p75_p3 }
  0x20   : > { %s1423_s20 = sshll.u32 %s2526_s12, 1  ;;  %s63_s13 = ssub.s32 %s2058_s27, %s2526_s12 }
  0x21   : > { %s60_s15 = sadd.s32 %s1423_s20, %s2522_s11  ;;  %p112_p7 = scmp.eq.s32.totalorder %s63_s13, 0 }
  0x22   : > { %s61_s26 = sld [smem:[#allocation4 + %s60_s15]]  ;;  %p127_p8 = scmp.ne.s32.totalorder %s2030_s0, %s2026_s21 }
  0x23   : > { %s2226_s10 = scalar_select %p112_p7, %s2034_s22, %s114_s17  }
  0x24   : > { %p2228_p9 = scmp.eq.s32.totalorder %s1420_s29, 0  ;;  %p261_p10 = scmp.eq.s32.totalorder %s1420_s29, 3 }
  0x25   : > { %2492 = sst [smem:[#allocation22_spill]] %s2226_s10  ;;  %p267_p11 = scmp.eq.s32.totalorder %s1421_s30, 3 }
  0x26   : > { %p1424_p12 = scmp.ge.s32.totalorder %s2062_s28, 1  ;;  %p2235_p13 = por %p2228_p9, %p127_p8 }
  0x27   : > { %p2242_p0 = por %p261_p10, %p121_p4  ;;  %p2246_p1 = por %p267_p11, %p127_p8 }
  0x28   : > { %p274_p2 = scmp.lt.s32.totalorder %s2062_s28, 5  ;;  %s62_s20 = ssub.s32 %s58_s16, %s61_s26 }
  0x29   : > { %s2495_s15 = scalar_select %p2242_p0, 1, 0 }
  0x2a   : > { %s2497_s17 = scalar_select %p2246_p1, 1, 0 }
  0x2b   : > { %2496 = sst [smem:[#allocation23_spill]] %s2495_s15  ;;  %s64_s11 = sor.u32 %s63_s13, %s62_s20 }
  0x2c   : > { %2498 = sst [smem:[#allocation24_spill]] %s2497_s17  ;;  %p2251_p3 = pnand %p1424_p12, %p274_p2 }
  0x2d   : > { %p65_p7 = scmp.eq.s32.totalorder %s64_s11, 0  ;;  %s2500_s6 = sld [smem:[#allocation26_spill]] }
  0x2e   : > { %p1717_p4 = pneg %p2251_p3  ;;  %s2501_s15 = sadd.s32 1, %s2042_s23 }
  0x2f   : > { %s2263_s9 = scalar_select %p65_p7, %s2042_s23, %s2501_s15  }
  0x30   : > { %p1718_p8 = pnand %p1717_p4, %p2228_p9  ;;  %s2066_s26 = smov [#allocation10]  }
  0x31   : > { %s290_s16 = sshll.u32 %s2066_s26, 4  ;;  %s2502_s8 = sld [smem:[#allocation28_spill]]  ;;  %s291_s16 = int_to_ptr.vmem [resolvable:$true] %s290_s16 }
  0x32   : > { %s2067_s11 = smov 64   ;;  %s2068_s3 = smov 4  }
  0x33   : > { %s288_s21 = sshll.u32 %s2500_s6, 4  ;;  %s2069_s10 = smov [#allocation12]   ;;  %s289_s21 = int_to_ptr.hbm [resolvable:$true] %s288_s21 }
  0x34   : > { %1720 = dma.hbm_to_vmem [thread:$0]  (!%p1718_p8), %s289_s21, 1024, %s291_s16, [#allocation11], %s2067_s11, %s2067_s11, %s2068_s3  }
  0x35   : > { %s307_s30 = sshll.u32 %s2069_s10, 4  ;;  %p1427_p10 = scmp.ge.s32.totalorder %s2062_s28, 4  ;;  %s308_s30 = int_to_ptr.vmem [resolvable:$true] %s307_s30 }
  0x37   : > { %s305_s17 = sshll.u32 %s2502_s8, 4  ;;  %320 = sbr.rel (%p1427_p10) target bundleno = 81 (0x51), region = 36  ;;  %s306_s17 = int_to_ptr.hbm [resolvable:$true] %s305_s17 }
  0x38   : > { %1723 = dma.hbm_to_vmem [thread:$0]  (!%p1718_p8), %s306_s17, 1024, %s308_s30, [#allocation11], %s2067_s11, %s2067_s11, %s2068_s3  }
  0x3c   : > { %323 = sbr.rel (!%p2208_p5) target bundleno = 75 (0x4b), region = 40  ;;  %s330_s15 = sld [smem:[#allocation4 + %s2193_s14]] (%p2208_p5) }
  0x3d   : > { %s325_s26 = sand.u32 (%p2208_p5), 1, %s2042_s23  }
  0x3e   : > { %s1428_s13 = sshll.u32 (%p2208_p5), %s325_s26, 5 }
  0x3f   : > { %s327_s3 = scalar_lea.vmem (%p2208_p5), [#allocation6], %s1428_s13 }
  0x42   : > { %s1583_s20 = sshll.u32 %s330_s15, 3 }
  0x43   : > { %s333_s6 = sadd.s32 %s2058_s27, %s1583_s20 }
  0x44   : > { %s1432_s21 = sshll.u32 %s333_s6, 3 }
  0x45   : > { %s335_s10 = scalar_lea.vmem %s2462_s2, %s1432_s21 }
  0x46   : > { %v370_v0 = vld [vmem:[%s335_s10] sm:$0xff]  ;;  %v372_v1 = vld [vmem:[%s335_s10 + $0x10] sm:$0xff] }
  0x47   : > { %v374_v2 = vld [vmem:[%s335_s10 + $0x20] sm:$0xff]  ;;  %371 = vst [vmem:[%s327_s3] sm:$0xff] %v370_v0  ;;  %v376_v3 = vld [vmem:[%s335_s10 + $0x30] sm:$0xff] }
  0x48   : > { %373 = vst [vmem:[%s327_s3 + $0x8] sm:$0xff] %v372_v1 }
  0x49   : > { %375 = vst [vmem:[%s327_s3 + $0x10] sm:$0xff] %v374_v2 }
  0x4a   : > { %377 = vst [vmem:[%s327_s3 + $0x18] sm:$0xff] %v376_v3 }
  0x4b PF: > { %s384_s14 = sand.u32 1, %s2034_s22   ;;  %s1584_s18 = sshll.u32 %s2058_s27, 6 }
  0x4c   : > { %s1433_s6 = sshll.u32 %s384_s14, 6  ;;  %s393_s8 = scalar_lea.hbm %s2464_s4, %s1584_s18 }
  0x4d   : > { %s394_s30 = sshll.u32 %s393_s8, 4  ;;  %s388_s15 = scalar_lea.vmem [#allocation7], %s1433_s6  ;;  %s395_s30 = int_to_ptr.hbm [resolvable:$true] %s394_s30 }
  0x4e   : > { %s396_s26 = sshll.u32 %s388_s15, 4  ;;  %s385_s13 = scalar_lea.sflag [#allocation8], %s384_s14  ;;  %s397_s26 = int_to_ptr.vmem [resolvable:$true] %s396_s26 }
  0x4f   : > { %s2070_s20 = smov 64   ;;  %s2071_s21 = smov 4  }
  0x50   : > { %1709 = dma.hbm_to_vmem [thread:$0]  (%p2215_p6), %s395_s30, 1024, %s397_s26, %s385_s13, %s2070_s20, %s2070_s20, %s2071_s21  }
  0x51 PF: > { %417 = sbr.rel (%p2251_p3) target bundleno = 916 (0x394), region = 86  ;;  %s420_s16 = sand.u32 (!%p2251_p3), 1, %s2038_s1  }
  0x52   : > { %s2290_s10 = sand.u32 (!%p2251_p3), 1, %s2030_s0   ;;  %s1437_s3 = sshll.u32 (!%p2251_p3), %s420_s16, 5 }
  0x53   : > { %s1438_s18 = sshll.u32 (!%p2251_p3), %s2290_s10, 6  ;;  %s2293_s6 = scalar_lea.vmem (!%p2251_p3), [#allocation6], %s1437_s3 }
  0x54   : > { %s427_s14 = scalar_lea.sflag (!%p2251_p3), [#allocation8], %s2290_s10  ;;  %s2296_s17 = scalar_lea.vmem (!%p2251_p3), [#allocation7], %s1438_s18 }
  0x56   : > { %2013 = dma.done.wait (%p2235_p13), %s427_s14, 1024  }
  0x57   : > { %2015 = vsyncadd (%p2235_p13), %s427_s14, 4294966272 }
  0x58   : > { %2017 = dma.done.wait (%p2228_p9), [#allocation11], 2048  }
  0x59   : > { %2019 = vsyncadd (%p2228_p9), [#allocation11], 4294965248  ;;  %s1442_s1 = sshll.u32 %s2050_s25, 4  ;;  %s2312_s30 = scalar_lea.vmem [#allocation13], %s1438_s18 }
  0x5a   : > { %p489_p5 = scmp.lt.s32.totalorder %s1442_s1, 31  ;;  %p1444_p6 = scmp.ne.s32.totalorder %s2046_s24, 0 }
  0x5c   : > { %s2528_s1 = smov (!%p489_p5, %s1442_s1), 31  ;;  %498 = sbr.rel (%p1444_p6) target bundleno = 114 (0x72), region = 106 }
  0x5d   : > { %s1443_s19 = sshll.u32 %s2528_s1, 3 }
  0x5e   : > { %s2310_s8 = scalar_lea.vmem %s2465_s5, %s1443_s19 }
  0x61   : > { %v2072_v4 = vmov 0.0  }
  0x62   : > { %499 = vst [vmem:[#allocation2 + $0x30] sm:$0xff] %v2072_v4 }
  0x63   : > { %500 = vst [vmem:[#allocation2] sm:$0xff] %v2072_v4 }
  0x64   : > { %501 = vst [vmem:[#allocation2 + $0x58] sm:$0xff] %v2072_v4 }
  0x65   : > { %502 = vst [vmem:[#allocation2 + $0x18] sm:$0xff] %v2072_v4 }
  0x66   : > { %503 = vst [vmem:[#allocation2 + $0x50] sm:$0xff] %v2072_v4 }
  0x67   : > { %504 = vst [vmem:[#allocation2 + $0x68] sm:$0xff] %v2072_v4 }
  0x68   : > { %505 = vst [vmem:[#allocation2 + $0x8] sm:$0xff] %v2072_v4 }
  0x69   : > { %506 = vst [vmem:[#allocation2 + $0x48] sm:$0xff] %v2072_v4 }
  0x6a   : > { %507 = vst [vmem:[#allocation2 + $0x40] sm:$0xff] %v2072_v4 }
  0x6b   : > { %508 = vst [vmem:[#allocation2 + $0x20] sm:$0xff] %v2072_v4 }
  0x6c   : > { %509 = vst [vmem:[#allocation2 + $0x10] sm:$0xff] %v2072_v4 }
  0x6d   : > { %510 = vst [vmem:[#allocation2 + $0x38] sm:$0xff] %v2072_v4 }
  0x6e   : > { %511 = vst [vmem:[#allocation2 + $0x60] sm:$0xff] %v2072_v4 }
  0x6f   : > { %512 = vst [vmem:[#allocation2 + $0x70] sm:$0xff] %v2072_v4 }
  0x70   : > { %513 = vst [vmem:[#allocation2 + $0x78] sm:$0xff] %v2072_v4 }
  0x71   : > { %514 = vst [vmem:[#allocation2 + $0x28] sm:$0xff] %v2072_v4 }
  0x72 PF: > { %s515_s7 = sld [smem:[#allocation5 + %s2050_s25]] }
  0x78   : > { %p1445_p9 = scmp.ge.s32.totalorder %s2046_s24, %s515_s7 }
  0x79   : > { %s1446_s12 = sshll.u32 (!%p1445_p9), %s2050_s25, 1  ;;  %s2503_s18 = sld [smem:[#allocation25_spill]] (!%p1445_p9) }
  0x7a   : > { %519 = sbr.rel (%p1445_p9) target bundleno = 562 (0x232), region = 110  ;;  %s565_s15 = sadd.s32 (!%p1445_p9), %s2046_s24, %s1446_s12 }
  0x7b   : > { %s566_s26 = sld [smem:[#allocation4 + %s565_s15]] (!%p1445_p9) }
  0x7f   : > { %v520_v5 = vld [vmem:[%s2293_s6] sm:$0xff]  ;;  %v521_v16 = vld [vmem:[%s2293_s6 + $0x8] sm:$0xff]  ;;  %v522_v27 = vld [vmem:[%s2293_s6 + $0x10] sm:$0xff] }
  0x80   : > { %v524_v6 = vunpack.c.0.s8 %v520_v5  ;;  %v525_v7 = vunpack.c.1.s8 %v520_v5  ;;  %v526_v11 = vunpack.c.2.s8 %v520_v5  ;;  %v527_v12 = vunpack.c.3.s8 %v520_v5  ;;  %v523_v39 = vld [vmem:[%s2293_s6 + $0x18] sm:$0xff]  ;;  %v588_v1 = vld [vmem:[#allocation2 + $0x30] sm:$0xff]  ;;  %v589_v4 = vld [vmem:[#allocation2] sm:$0xff] }
  0x81   : > { %v528_v17 = vunpack.c.0.s8 %v521_v16  ;;  %v529_v18 = vunpack.c.1.s8 %v521_v16  ;;  %v530_v22 = vunpack.c.2.s8 %v521_v16  ;;  %v531_v23 = vunpack.c.3.s8 %v521_v16  ;;  %s1447_s13 = sshll.u32 %s566_s26, 7  ;;  %v593_v16 = vld [vmem:[#allocation2 + $0x68] sm:$0xff] }
  0x82   : > { %v540_v8 = vcvt.s32.f32 %v524_v6  ;;  %v541_v9 = vcvt.s32.f32 %v525_v7  ;;  %v542_v13 = vcvt.s32.f32 %v526_v11  ;;  %v543_v14 = vcvt.s32.f32 %v527_v12  ;;  %s568_s20 = sshra.s32 %s1447_s13, 3  ;;  %v590_v7 = vld [vmem:[#allocation2 + $0x58] sm:$0xff] }
  0x83   : > { %v544_v19 = vcvt.s32.f32 %v528_v17  ;;  %v545_v20 = vcvt.s32.f32 %v529_v18  ;;  %v546_v24 = vcvt.s32.f32 %v530_v22  ;;  %v547_v25 = vcvt.s32.f32 %v531_v23  ;;  %s1448_s21 = sshll.u32 %s568_s20, 2  ;;  %v595_v22 = vld [vmem:[#allocation2 + $0x48] sm:$0xff] }
  0x84   : > { %v556_v10 = vpack.c.bf16 %v541_v9, %v540_v8  ;;  %v557_v15 = vpack.c.bf16 %v543_v14, %v542_v13  ;;  %v532_v28 = vunpack.c.0.s8 %v522_v27  ;;  %v533_v29 = vunpack.c.1.s8 %v522_v27  ;;  %s2325_s14 = scalar_lea.vmem %s2503_s18, %s1448_s21  ;;  %v592_v13 = vld [vmem:[#allocation2 + $0x50] sm:$0xff] }
  0x85   : > { %v558_v21 = vpack.c.bf16 %v545_v20, %v544_v19  ;;  %v559_v26 = vpack.c.bf16 %v547_v25, %v546_v24  ;;  %v534_v33 = vunpack.c.2.s8 %v522_v27  ;;  %v535_v34 = vunpack.c.3.s8 %v522_v27  ;;  %v1592_v38 = vld [vmem:[%s2325_s14 + $0x38] sm:$0xff]  ;;  %v1591_v40 = vld [vmem:[%s2325_s14 + $0x30] sm:$0xff]  ;;  %v1590_v43 = vld [vmem:[%s2325_s14 + $0x28] sm:$0xff] }
  0x86   : > { %604 = vxpose.xlu0.c.b16.start [1/8] %v556_v10, 128  ;;  %v548_v30 = vcvt.s32.f32 %v532_v28  ;;  %v549_v31 = vcvt.s32.f32 %v533_v29  ;;  %668 = vmatpush.bf16.msra.mxu0 %v1592_v38  ;;  %v536_v41 = vunpack.c.0.s8 %v523_v39  ;;  %v537_v42 = vunpack.c.1.s8 %v523_v39  ;;  %v1589_v46 = vld [vmem:[%s2325_s14 + $0x20] sm:$0xff]  ;;  %v1588_v48 = vld [vmem:[%s2325_s14 + $0x18] sm:$0xff]  ;;  %v1587_v49 = vld [vmem:[%s2325_s14 + $0x10] sm:$0xff] }
  0x87   : > { %v550_v35 = vcvt.s32.f32 %v534_v33  ;;  %v551_v36 = vcvt.s32.f32 %v535_v34  ;;  %1665 = vmatpush.bf16.msra.mxu1 %v1592_v38  ;;  %1666 = vmatpush.bf16.msra.mxu2 %v1592_v38  ;;  %v538_v50 = vunpack.c.2.s8 %v523_v39  ;;  %v539_v51 = vunpack.c.3.s8 %v523_v39  ;;  %v1586_v52 = vld [vmem:[%s2325_s14 + $0x8] sm:$0xff]  ;;  %v1585_v55 = vld [vmem:[%s2325_s14] sm:$0xff]  ;;  %v591_v10 = vld [vmem:[#allocation2 + $0x18] sm:$0xff] }
  0x88   : > { %v560_v32 = vpack.c.bf16 %v549_v31, %v548_v30  ;;  %1667 = vmatpush.bf16.msra.mxu3 %v1592_v38  ;;  %v552_v44 = vcvt.s32.f32 %v536_v41  ;;  %v553_v45 = vcvt.s32.f32 %v537_v42  ;;  %v594_v19 = vld [vmem:[#allocation2 + $0x8] sm:$0xff]  ;;  %v596_v25 = vld [vmem:[#allocation2 + $0x40] sm:$0xff]  ;;  %v598_v31 = vld [vmem:[#allocation2 + $0x10] sm:$0xff] }
  0x89   : > { %v561_v37 = vpack.c.bf16 %v551_v36, %v550_v35  ;;  %v554_v53 = vcvt.s32.f32 %v538_v50  ;;  %v555_v54 = vcvt.s32.f32 %v539_v51  ;;  %v597_v28 = vld [vmem:[#allocation2 + $0x20] sm:$0xff]  ;;  %v599_v34 = vld [vmem:[#allocation2 + $0x38] sm:$0xff] }
  0x8a   : > { %669 = vmatpush.bf16.msra.mxu0 %v1591_v40  ;;  %v562_v47 = vpack.c.bf16 %v553_v45, %v552_v44 }
  0x8b   : > { %1668 = vmatpush.bf16.msra.mxu1 %v1591_v40  ;;  %1669 = vmatpush.bf16.msra.mxu2 %v1591_v40  ;;  %v563_v56 = vpack.c.bf16 %v555_v54, %v554_v53 }
  0x8c   : > { %1670 = vmatpush.bf16.msra.mxu3 %v1591_v40  ;;  %v601_v40 = vld [vmem:[#allocation2 + $0x70] sm:$0xff] }
  0x8e   : > { %670 = vmatpush.bf16.msra.mxu0 %v1590_v43 }
  0x8f   : > { %1671 = vmatpush.bf16.msra.mxu1 %v1590_v43  ;;  %1672 = vmatpush.bf16.msra.mxu2 %v1590_v43 }
  0x90   : > { %1673 = vmatpush.bf16.msra.mxu3 %v1590_v43  ;;  %v602_v43 = vld [vmem:[#allocation2 + $0x78] sm:$0xff] }
  0x92   : > { %671 = vmatpush.bf16.msra.mxu0 %v1589_v46 }
  0x93   : > { %1674 = vmatpush.bf16.msra.mxu1 %v1589_v46  ;;  %1675 = vmatpush.bf16.msra.mxu2 %v1589_v46 }
  0x94   : > { %1676 = vmatpush.bf16.msra.mxu3 %v1589_v46  ;;  %v603_v46 = vld [vmem:[#allocation2 + $0x28] sm:$0xff] }
  0x96   : > { %605 = vxpose.xlu0.c.b16.cont [2/8] %v557_v15, 128  ;;  %672 = vmatpush.bf16.msra.mxu0 %v1588_v48 }
  0x97   : > { %1677 = vmatpush.bf16.msra.mxu1 %v1588_v48  ;;  %1678 = vmatpush.bf16.msra.mxu2 %v1588_v48 }
  0x98   : > { %1679 = vmatpush.bf16.msra.mxu3 %v1588_v48 }
  0x9a   : > { %673 = vmatpush.bf16.msra.mxu0 %v1587_v49 }
  0x9b   : > { %1680 = vmatpush.bf16.msra.mxu1 %v1587_v49  ;;  %1681 = vmatpush.bf16.msra.mxu2 %v1587_v49 }
  0x9c   : > { %1682 = vmatpush.bf16.msra.mxu3 %v1587_v49 }
  0x9e   : > { %674 = vmatpush.bf16.msra.mxu0 %v1586_v52 }
  0x9f   : > { %1683 = vmatpush.bf16.msra.mxu1 %v1586_v52  ;;  %1684 = vmatpush.bf16.msra.mxu2 %v1586_v52 }
  0xa0   : > { %1685 = vmatpush.bf16.msra.mxu3 %v1586_v52 }
  0xa2   : > { %675 = vmatpush.bf16.msra.mxu0 %v1585_v55 }
  0xa3   : > { %1686 = vmatpush.bf16.msra.mxu1 %v1585_v55  ;;  %1687 = vmatpush.bf16.msra.mxu2 %v1585_v55 }
  0xa4   : > { %1688 = vmatpush.bf16.msra.mxu3 %v1585_v55 }
  0xa6   : > { %606 = vxpose.xlu0.c.b16.cont [3/8] %v558_v21, 128 }
  0xb6   : > { %607 = vxpose.xlu0.c.b16.cont [4/8] %v559_v26, 128 }
  0xc6   : > { %608 = vxpose.xlu0.c.b16.cont [5/8] %v560_v32, 128 }
  0xd6   : > { %609 = vxpose.xlu0.c.b16.cont [6/8] %v561_v37, 128  ;;  %v600_v37 = vld [vmem:[#allocation2 + $0x60] sm:$0xff] }
  0xe6   : > { %610 = vxpose.xlu0.c.b16.cont [7/8] %v562_v47, 128 }
  0xf6   : > { %611 = vxpose.xlu0.c.b16.end [8/8] %v563_v56, 128 }
 0x132   : > { %v612_v57 = vpop.trf.xlu0 }
 0x133   : > { %676 = vmatmul.bf16.vlgmr.msra.gmra.mxu0 %v612_v57 }
 0x142   : > { %v613_v58 = vpop.trf.xlu0 }
 0x143   : > { %681 = vmatmul.bf16.gmra.mxu0 %v613_v58 }
 0x152   : > { %v614_v59 = vpop.trf.xlu0 }
 0x153   : > { %686 = vmatmul.bf16.vlgmr.msra.gmra.mxu1 %v614_v59 }
 0x162   : > { %v615_v60 = vpop.trf.xlu0 }
 0x163   : > { %691 = vmatmul.bf16.gmra.mxu1 %v615_v60 }
 0x172   : > { %v616_v61 = vpop.trf.xlu0 }
 0x173   : > { %696 = vmatmul.bf16.vlgmr.msra.gmra.mxu2 %v616_v61 }
 0x182   : > { %v617_v62 = vpop.trf.xlu0 }
 0x183   : > { %701 = vmatmul.bf16.gmra.mxu2 %v617_v62 }
 0x192   : > { %v618_v63 = vpop.trf.xlu0 }
 0x193   : > { %706 = vmatmul.bf16.vlgmr.msra.gmra.mxu3 %v618_v63 }
 0x1a2   : > { %v619_v0 = vpop.trf.xlu0 }
 0x1a3   : > { %711 = vmatmul.bf16.gmra.mxu3 %v619_v0 }
 0x1b0   : > { %v677_v2 = vpop.f32.mrf.mxu0 }
 0x1b1   : > { %v717_v3 = vadd.f32 %v677_v2, %v588_v1 }
 0x1b3   : > { %733 = vst [vmem:[#allocation2 + $0x30] sm:$0xff] %v717_v3 }
 0x1b8   : > { %v679_v5 = vpop.f32.mrf.mxu0 }
 0x1b9   : > { %v718_v6 = vadd.f32 %v679_v5, %v589_v4 }
 0x1bb   : > { %734 = vst [vmem:[#allocation2] sm:$0xff] %v718_v6 }
 0x1c0   : > { %v682_v8 = vpop.f32.mrf.mxu0 }
 0x1c1   : > { %v719_v9 = vadd.f32 %v682_v8, %v590_v7 }
 0x1c3   : > { %735 = vst [vmem:[#allocation2 + $0x58] sm:$0xff] %v719_v9 }
 0x1c8   : > { %v684_v11 = vpop.f32.mrf.mxu0 }
 0x1c9   : > { %v720_v12 = vadd.f32 %v684_v11, %v591_v10 }
 0x1cb   : > { %736 = vst [vmem:[#allocation2 + $0x18] sm:$0xff] %v720_v12 }
 0x1d0   : > { %v687_v14 = vpop.f32.mrf.mxu1 }
 0x1d1   : > { %v721_v15 = vadd.f32 %v687_v14, %v592_v13 }
 0x1d3   : > { %737 = vst [vmem:[#allocation2 + $0x50] sm:$0xff] %v721_v15 }
 0x1d8   : > { %v689_v17 = vpop.f32.mrf.mxu1 }
 0x1d9   : > { %v722_v18 = vadd.f32 %v689_v17, %v593_v16 }
 0x1db   : > { %738 = vst [vmem:[#allocation2 + $0x68] sm:$0xff] %v722_v18 }
 0x1e0   : > { %v692_v20 = vpop.f32.mrf.mxu1 }
 0x1e1   : > { %v723_v21 = vadd.f32 %v692_v20, %v594_v19 }
 0x1e3   : > { %739 = vst [vmem:[#allocation2 + $0x8] sm:$0xff] %v723_v21 }
 0x1e8   : > { %v694_v23 = vpop.f32.mrf.mxu1 }
 0x1e9   : > { %v724_v24 = vadd.f32 %v694_v23, %v595_v22 }
 0x1eb   : > { %740 = vst [vmem:[#allocation2 + $0x48] sm:$0xff] %v724_v24 }
 0x1f6   : > { %v697_v26 = vpop.f32.mrf.mxu2 }
 0x1f7   : > { %v725_v27 = vadd.f32 %v697_v26, %v596_v25 }
 0x1f9   : > { %741 = vst [vmem:[#allocation2 + $0x40] sm:$0xff] %v725_v27 }
 0x1fe   : > { %v699_v29 = vpop.f32.mrf.mxu2 }
 0x1ff   : > { %v726_v30 = vadd.f32 %v699_v29, %v597_v28 }
 0x201   : > { %742 = vst [vmem:[#allocation2 + $0x20] sm:$0xff] %v726_v30 }
 0x206   : > { %v702_v32 = vpop.f32.mrf.mxu2 }
 0x207   : > { %v727_v33 = vadd.f32 %v702_v32, %v598_v31 }
 0x209   : > { %743 = vst [vmem:[#allocation2 + $0x10] sm:$0xff] %v727_v33 }
 0x20e   : > { %v704_v35 = vpop.f32.mrf.mxu2 }
 0x20f   : > { %v728_v36 = vadd.f32 %v704_v35, %v599_v34 }
 0x211   : > { %744 = vst [vmem:[#allocation2 + $0x38] sm:$0xff] %v728_v36 }
 0x216   : > { %v707_v38 = vpop.f32.mrf.mxu3 }
 0x217   : > { %v729_v39 = vadd.f32 %v707_v38, %v600_v37 }
 0x219   : > { %745 = vst [vmem:[#allocation2 + $0x60] sm:$0xff] %v729_v39 }
 0x21e   : > { %v709_v41 = vpop.f32.mrf.mxu3 }
 0x21f   : > { %v730_v42 = vadd.f32 %v709_v41, %v601_v40 }
 0x221   : > { %746 = vst [vmem:[#allocation2 + $0x70] sm:$0xff] %v730_v42 }
 0x226   : > { %v712_v44 = vpop.f32.mrf.mxu3 }
 0x227   : > { %v731_v45 = vadd.f32 %v712_v44, %v602_v43 }
 0x229   : > { %747 = vst [vmem:[#allocation2 + $0x78] sm:$0xff] %v731_v45 }
 0x22e   : > { %v714_v47 = vpop.f32.mrf.mxu3 }
 0x22f   : > { %v732_v48 = vadd.f32 %v714_v47, %v603_v46 }
 0x231   : > { %748 = vst [vmem:[#allocation2 + $0x28] sm:$0xff] %v732_v48 }
 0x232 PF: > { %p1481_p11 = scmp.ne.s32.totalorder %s2046_s24, 1 }
 0x233   : > { %s2505_s29 = sld [smem:[#allocation27_spill]] (!%p1481_p11) }
 0x234   : > { %752 = sbr.rel (%p1481_p11) target bundleno = 895 (0x37f), region = 114 }
 0x239   : > { %v777_v49 = vld [vmem:[%s2310_s8 + $0x40] sm:$0xff]  ;;  %v2073_v51 = vmov 0   ;;  %v779_v52 = vld [vmem:[%s2310_s8 + $0x50] sm:$0xff]  ;;  %v778_v53 = vld [vmem:[%s2310_s8 + $0x48] sm:$0xff] }
 0x23a   : > { %v769_v50 = vld [vmem:[%s2310_s8] sm:$0xff]  ;;  %1826 = vset.pattern.permute.xlu1 %v2073_v51  ;;  %1825 = vset.pattern.permute.xlu0 %v2073_v51  ;;  %v770_v54 = vld [vmem:[%s2310_s8 + $0x8] sm:$0xff]  ;;  %v780_v55 = vld [vmem:[%s2310_s8 + $0x58] sm:$0xff] }
 0x23b   : > { %827 = vperm.xlu0 %1825, %v777_v49   ;;  %787 = vperm.xlu1 %1826, %v769_v50   ;;  %v1616_v56 = vld [vmem:[#allocation12 + $0x38] sm:$0xff]  ;;  %v1615_v58 = vld [vmem:[#allocation12 + $0x30] sm:$0xff]  ;;  %v1614_v61 = vld [vmem:[#allocation12 + $0x28] sm:$0xff] }
 0x23c   : > { %1827 = vset.pattern.permute.xlu2 %v2073_v51  ;;  %v1600_v57 = vld [vmem:[#allocation10 + $0x38] sm:$0xff]  ;;  %1697 = vmatpush.bf16.msra.mxu3 %v1616_v56  ;;  %v771_v59 = vld [vmem:[%s2310_s8 + $0x10] sm:$0xff]  ;;  %v781_v62 = vld [vmem:[%s2310_s8 + $0x60] sm:$0xff] }
 0x23d   : > { %837 = vperm.xlu2 %1827, %v779_v52   ;;  %1154 = vmatpush.bf16.msra.mxu1 %v1616_v56  ;;  %v772_v60 = vld [vmem:[%s2310_s8 + $0x18] sm:$0xff]  ;;  %v782_v63 = vld [vmem:[%s2310_s8 + $0x68] sm:$0xff]  ;;  %v773_v0 = vld [vmem:[%s2310_s8 + $0x20] sm:$0xff] }
 0x23e   : > { %957 = vmatpush.bf16.msra.mxu0 %v1600_v57  ;;  %1689 = vmatpush.bf16.msra.mxu2 %v1600_v57  ;;  %v774_v1 = vld [vmem:[%s2310_s8 + $0x28] sm:$0xff]  ;;  %v783_v2 = vld [vmem:[%s2310_s8 + $0x70] sm:$0xff]  ;;  %v784_v3 = vld [vmem:[%s2310_s8 + $0x78] sm:$0xff] }
 0x23f   : > { %v775_v4 = vld [vmem:[%s2310_s8 + $0x30] sm:$0xff]  ;;  %v776_v5 = vld [vmem:[%s2310_s8 + $0x38] sm:$0xff]  ;;  %v1613_v7 = vld [vmem:[#allocation12 + $0x20] sm:$0xff] }
 0x240   : > { %1698 = vmatpush.bf16.msra.mxu3 %v1615_v58  ;;  %v1599_v6 = vld [vmem:[#allocation10 + $0x30] sm:$0xff]  ;;  %v1598_v8 = vld [vmem:[#allocation10 + $0x28] sm:$0xff]  ;;  %v1612_v9 = vld [vmem:[#allocation12 + $0x18] sm:$0xff] }
 0x241   : > { %1155 = vmatpush.bf16.msra.mxu1 %v1615_v58  ;;  %v1597_v10 = vld [vmem:[#allocation10 + $0x20] sm:$0xff]  ;;  %v1611_v11 = vld [vmem:[#allocation12 + $0x10] sm:$0xff]  ;;  %v1596_v12 = vld [vmem:[#allocation10 + $0x18] sm:$0xff] }
 0x242   : > { %958 = vmatpush.bf16.msra.mxu0 %v1599_v6  ;;  %1690 = vmatpush.bf16.msra.mxu2 %v1599_v6  ;;  %v1610_v13 = vld [vmem:[#allocation12 + $0x8] sm:$0xff]  ;;  %v1595_v14 = vld [vmem:[#allocation10 + $0x10] sm:$0xff]  ;;  %v1609_v15 = vld [vmem:[#allocation12] sm:$0xff] }
 0x243   : > { %832 = vperm.xlu0 %1825, %v778_v53   ;;  %792 = vperm.xlu1 %1826, %v770_v54   ;;  %v1605_v16 = vld [vmem:[%s2296_s17 + $0x20] sm:$0xff]  ;;  %v1594_v17 = vld [vmem:[#allocation10 + $0x8] sm:$0xff]  ;;  %v1607_v24 = vld [vmem:[%s2296_s17 + $0x30] sm:$0xff] }
 0x244   : > { %1699 = vmatpush.bf16.msra.mxu3 %v1614_v61  ;;  %v1593_v18 = vld [vmem:[#allocation10] sm:$0xff]  ;;  %v1606_v20 = vld [vmem:[%s2296_s17 + $0x28] sm:$0xff]  ;;  %v753_v26 = vld [vmem:[#allocation2 + $0x30] sm:$0xff] }
 0x245   : > { %842 = vperm.xlu2 %1827, %v780_v55   ;;  %1156 = vmatpush.bf16.msra.mxu1 %v1614_v61  ;;  %v1601_v19 = vld [vmem:[%s2296_s17] sm:$0xff]  ;;  %v1602_v21 = vld [vmem:[%s2296_s17 + $0x8] sm:$0xff]  ;;  %v1603_v36 = vld [vmem:[%s2296_s17 + $0x10] sm:$0xff] }
 0x246   : > { %959 = vmatpush.bf16.msra.mxu0 %v1598_v8  ;;  %1691 = vmatpush.bf16.msra.mxu2 %v1598_v8  ;;  %v761_v25 = vld [vmem:[#allocation2 + $0x40] sm:$0xff]  ;;  %v1608_v39 = vld [vmem:[%s2296_s17 + $0x38] sm:$0xff]  ;;  %v763_v40 = vld [vmem:[#allocation2 + $0x10] sm:$0xff] }
 0x247   : > { %v762_v27 = vld [vmem:[#allocation2 + $0x20] sm:$0xff]  ;;  %v764_v42 = vld [vmem:[#allocation2 + $0x38] sm:$0xff]  ;;  %v766_v56 = vld [vmem:[#allocation2 + $0x70] sm:$0xff] }
 0x248   : > { %1700 = vmatpush.bf16.msra.mxu3 %v1613_v7  ;;  %v754_v28 = vld [vmem:[#allocation2] sm:$0xff]  ;;  %v755_v44 = vld [vmem:[#allocation2 + $0x58] sm:$0xff]  ;;  %v757_v58 = vld [vmem:[#allocation2 + $0x50] sm:$0xff] }
 0x249   : > { %1157 = vmatpush.bf16.msra.mxu1 %v1613_v7  ;;  %v756_v46 = vld [vmem:[#allocation2 + $0x18] sm:$0xff]  ;;  %v768_v7 = vld [vmem:[#allocation2 + $0x28] sm:$0xff] }
 0x24a   : > { %960 = vmatpush.bf16.msra.mxu0 %v1597_v10  ;;  %1692 = vmatpush.bf16.msra.mxu2 %v1597_v10  ;;  %v1604_v51 = vld [vmem:[%s2296_s17 + $0x18] sm:$0xff]  ;;  %s2504_s17 = sld [smem:[#allocation29_spill]] }
 0x24b   : > { %797 = vperm.xlu0 %1825, %v771_v59   ;;  %802 = vperm.xlu1 %1826, %v772_v60   ;;  %v765_v59 = vld [vmem:[#allocation2 + $0x60] sm:$0xff]  ;;  %v758_v60 = vld [vmem:[#allocation2 + $0x68] sm:$0xff] }
 0x24c   : > { %1701 = vmatpush.bf16.msra.mxu3 %v1612_v9 }
 0x24d   : > { %847 = vperm.xlu2 %1827, %v781_v62   ;;  %1158 = vmatpush.bf16.msra.mxu1 %v1612_v9  ;;  %v760_v9 = vld [vmem:[#allocation2 + $0x48] sm:$0xff] }
 0x24e   : > { %961 = vmatpush.bf16.msra.mxu0 %v1596_v12  ;;  %1693 = vmatpush.bf16.msra.mxu2 %v1596_v12 }
 0x250   : > { %1702 = vmatpush.bf16.msra.mxu3 %v1611_v11 }
 0x251   : > { %1159 = vmatpush.bf16.msra.mxu1 %v1611_v11  ;;  %v759_v11 = vld [vmem:[#allocation2 + $0x8] sm:$0xff] }
 0x252   : > { %962 = vmatpush.bf16.msra.mxu0 %v1595_v14  ;;  %1694 = vmatpush.bf16.msra.mxu2 %v1595_v14 }
 0x253   : > { %852 = vperm.xlu0 %1825, %v782_v63   ;;  %807 = vperm.xlu1 %1826, %v773_v0  }
 0x254   : > { %1703 = vmatpush.bf16.msra.mxu3 %v1610_v13 }
 0x255   : > { %812 = vperm.xlu2 %1827, %v774_v1   ;;  %1160 = vmatpush.bf16.msra.mxu1 %v1610_v13 }
 0x256   : > { %963 = vmatpush.bf16.msra.mxu0 %v1594_v17  ;;  %1695 = vmatpush.bf16.msra.mxu2 %v1594_v17 }
 0x258   : > { %1704 = vmatpush.bf16.msra.mxu3 %v1609_v15 }
 0x259   : > { %1161 = vmatpush.bf16.msra.mxu1 %v1609_v15 }
 0x25a   : > { %964 = vmatpush.bf16.msra.mxu0 %v1593_v18  ;;  %1696 = vmatpush.bf16.msra.mxu2 %v1593_v18 }
 0x25b   : > { %857 = vperm.xlu0 %1825, %v783_v2   ;;  %862 = vperm.xlu1 %1826, %v784_v3  }
 0x25c   : > { %1182 = vmatmul.bf16.vlgmr.msra.gmra.mxu3 %v1605_v16  ;;  %1162 = vmatmul.bf16.vlgmr.msra.gmra.mxu1 %v1601_v19 }
 0x25d   : > { %817 = vperm.xlu2 %1827, %v775_v4  }
 0x263   : > { %822 = vperm.xlu0 %1825, %v776_v5   ;;  %v767_v5 = vld [vmem:[#allocation2 + $0x78] sm:$0xff] }
 0x26c   : > { %1187 = vmatmul.bf16.gmra.mxu3 %v1606_v20  ;;  %1167 = vmatmul.bf16.gmra.mxu1 %v1602_v21 }
 0x27c   : > { %1192 = vmatmul.bf16.gmra.mxu3 %v1607_v24  ;;  %1172 = vmatmul.bf16.gmra.mxu1 %v1603_v36  ;;  %v2369_v24 = vld [vmem:[%s2505_s29] ss:$0 sm:$0xff] }
 0x28c   : > { %1197 = vmatmul.bf16.gmra.mxu3 %v1608_v39  ;;  %1177 = vmatmul.bf16.gmra.mxu1 %v1604_v51 }
 0x297   : > { %v838_v31 = vpop.permute.xlu2 %837 }
 0x298   : > { %v875_v47 = vmul.f32 %v838_v31, %v763_v40 }
 0x29f   : > { %v843_v41 = vpop.permute.xlu2 %842 }
 0x2a0   : > { %v876_v48 = vmul.f32 %v843_v41, %v764_v42 }
 0x2a2   : > { %v886_v53 = vpack.c.bf16 %v876_v48, %v875_v47 }
 0x2a7   : > { %v848_v54 = vpop.permute.xlu2 %847 }
 0x2a8   : > { %v877_v0 = vmul.f32 %v848_v54, %v765_v59 }
 0x2ad   : > { %v828_v22 = vpop.permute.xlu0 %827  ;;  %v788_v23 = vpop.permute.xlu1 %787 }
 0x2ae   : > { %v873_v32 = vmul.f32 %v828_v22, %v761_v25  ;;  %v865_v33 = vmul.f32 %v788_v23, %v753_v26  ;;  %v2364_v23 = vld [vmem:[%s2504_s17] ss:$0 sm:$0xff] }
 0x2af   : > { %v813_v63 = vpop.permute.xlu2 %812 }
 0x2b0   : > { %v870_v1 = vmul.f32 %v813_v63, %v758_v60 }
 0x2b5   : > { %v833_v29 = vpop.permute.xlu0 %832  ;;  %v793_v30 = vpop.permute.xlu1 %792 }
 0x2b6   : > { %v874_v34 = vmul.f32 %v833_v29, %v762_v27  ;;  %v866_v35 = vmul.f32 %v793_v30, %v754_v28 }
 0x2b7   : > { %v818_v10 = vpop.permute.xlu2 %817 }
 0x2b8   : > { %v881_v37 = vpack.c.bf16 %v866_v35, %v865_v33  ;;  %v885_v38 = vpack.c.bf16 %v874_v34, %v873_v32  ;;  %v871_v15 = vmul.f32 %v818_v10, %v759_v11 }
 0x2ba   : > { %965 = vmatmul.bf16.vlgmr.msra.gmra.mxu0 %v881_v37  ;;  %985 = vmatmul.bf16.vlgmr.msra.gmra.mxu2 %v885_v38 }
 0x2bd   : > { %v798_v43 = vpop.permute.xlu0 %797  ;;  %v803_v45 = vpop.permute.xlu1 %802 }
 0x2be   : > { %v867_v49 = vmul.f32 %v798_v43, %v755_v44  ;;  %v868_v50 = vmul.f32 %v803_v45, %v756_v46 }
 0x2c0   : > { %v882_v52 = vpack.c.bf16 %v868_v50, %v867_v49 }
 0x2c5   : > { %v853_v55 = vpop.permute.xlu0 %852  ;;  %v808_v57 = vpop.permute.xlu1 %807 }
 0x2c6   : > { %v878_v61 = vmul.f32 %v853_v55, %v766_v56  ;;  %v869_v62 = vmul.f32 %v808_v57, %v757_v58 }
 0x2c8   : > { %v883_v3 = vpack.c.bf16 %v870_v1, %v869_v62  ;;  %v887_v4 = vpack.c.bf16 %v878_v61, %v877_v0 }
 0x2ca   : > { %970 = vmatmul.bf16.gmra.mxu0 %v882_v52  ;;  %990 = vmatmul.bf16.gmra.mxu2 %v886_v53 }
 0x2cd   : > { %v858_v2 = vpop.permute.xlu0 %857  ;;  %v863_v6 = vpop.permute.xlu1 %862 }
 0x2ce   : > { %v879_v12 = vmul.f32 %v858_v2, %v767_v5  ;;  %v880_v13 = vmul.f32 %v863_v6, %v768_v7 }
 0x2d0   : > { %v888_v17 = vpack.c.bf16 %v880_v13, %v879_v12 }
 0x2d5   : > { %v823_v8 = vpop.permute.xlu0 %822 }
 0x2d6   : > { %v872_v14 = vmul.f32 %v823_v8, %v760_v9 }
 0x2d8   : > { %v884_v16 = vpack.c.bf16 %v872_v14, %v871_v15 }
 0x2d9   : > { %v1163_v18 = vpop.f32.mrf.mxu1 }
 0x2da   : > { %975 = vmatmul.bf16.gmra.mxu0 %v883_v3  ;;  %995 = vmatmul.bf16.gmra.mxu2 %v887_v4  ;;  %v1164_v26 = vadd.f32 %v2364_v23, %v1163_v18 }
 0x2dc   : > { %v1203_v32 = vmax.f32 %v1164_v26, 0.0 }
 0x2df   : > { %v1183_v19 = vpop.f32.mrf.mxu3 }
 0x2e0   : > { %v1184_v35 = vadd.f32 %v2364_v23, %v1183_v19 }
 0x2e1   : > { %v1165_v20 = vpop.f32.mrf.mxu1 }
 0x2e2   : > { %v1166_v29 = vadd.f32 %v2364_v23, %v1165_v20  ;;  %v1211_v44 = vmax.f32 %v1184_v35, 0.0 }
 0x2e4   : > { %v1204_v37 = vmax.f32 %v1166_v29, 0.0 }
 0x2e7   : > { %v1185_v21 = vpop.f32.mrf.mxu3 }
 0x2e8   : > { %v1186_v41 = vadd.f32 %v2364_v23, %v1185_v21 }
 0x2e9   : > { %v1168_v25 = vpop.f32.mrf.mxu1 }
 0x2ea   : > { %980 = vmatmul.bf16.gmra.mxu0 %v884_v16  ;;  %1000 = vmatmul.bf16.gmra.mxu2 %v888_v17  ;;  %v1212_v49 = vmax.f32 %v1186_v41, 0.0  ;;  %v1169_v55 = vadd.f32 %v2364_v23, %v1168_v25 }
 0x2ec   : > { %v1205_v61 = vmax.f32 %v1169_v55, 0.0 }
 0x2ef   : > { %v1188_v31 = vpop.f32.mrf.mxu3 }
 0x2f0   : > { %v1189_v0 = vadd.f32 %v2364_v23, %v1188_v31 }
 0x2f1   : > { %v1170_v39 = vpop.f32.mrf.mxu1 }
 0x2f2   : > { %v1171_v59 = vadd.f32 %v2364_v23, %v1170_v39  ;;  %v1213_v9 = vmax.f32 %v1189_v0, 0.0 }
 0x2f4   : > { %v1206_v2 = vmax.f32 %v1171_v59, 0.0 }
 0x2f7   : > { %v1190_v51 = vpop.f32.mrf.mxu3 }
 0x2f8   : > { %v1191_v6 = vadd.f32 %v2364_v23, %v1190_v51 }
 0x2f9   : > { %v1173_v58 = vpop.f32.mrf.mxu1 }
 0x2fa   : > { %v1214_v15 = vmax.f32 %v1191_v6, 0.0  ;;  %v1174_v20 = vadd.f32 %v2364_v23, %v1173_v58 }
 0x2ff   : > { %v1193_v4 = vpop.f32.mrf.mxu3 }
 0x301   : > { %v1175_v14 = vpop.f32.mrf.mxu1 }
 0x302   : > { %v1176_v26 = vadd.f32 %v2364_v23, %v1175_v14 }
 0x307   : > { %v1195_v25 = vpop.f32.mrf.mxu3 }
 0x309   : > { %v1178_v31 = vpop.f32.mrf.mxu1 }
 0x337   : > { %v966_v22 = vpop.f32.mrf.mxu0 }
 0x338   : > { %v967_v27 = vadd.f32 %v2369_v24, %v966_v22 }
 0x33a   : > { %v1006_v33 = vmax.f32 %v967_v27, 0.0 }
 0x33c   : > { %v1219_v40 = vadd.f32 %v1203_v32, %v1006_v33  ;;  %v1194_v32 = vadd.f32 %v2364_v23, %v1193_v4 }
 0x33d   : > { %v986_v28 = vpop.f32.mrf.mxu2 }
 0x33e   : > { %v987_v36 = vadd.f32 %v2369_v24, %v986_v28  ;;  %v1207_v28 = vmax.f32 %v1174_v20, 0.0 }
 0x33f   : > { %v968_v30 = vpop.f32.mrf.mxu0 }
 0x340   : > { %v969_v34 = vadd.f32 %v2369_v24, %v968_v30  ;;  %v1014_v45 = vmax.f32 %v987_v36, 0.0 }
 0x342   : > { %v1007_v38 = vmax.f32 %v969_v34, 0.0  ;;  %v1227_v52 = vadd.f32 %v1211_v44, %v1014_v45  ;;  %v1208_v34 = vmax.f32 %v1176_v26, 0.0  ;;  %v1198_v44 = vpop.f32.mrf.mxu3 }
 0x344   : > { %v1220_v42 = vadd.f32 %v1204_v37, %v1007_v38  ;;  %v1196_v37 = vadd.f32 %v2364_v23, %v1195_v25 }
 0x345   : > { %v988_v43 = vpop.f32.mrf.mxu2 }
 0x346   : > { %v1621_v46 = vpack.c.bf16 %v1220_v42, %v1219_v40  ;;  %v989_v47 = vadd.f32 %v2369_v24, %v988_v43  ;;  %v1215_v40 = vmax.f32 %v1194_v32, 0.0 }
 0x347   : > { %v971_v48 = vpop.f32.mrf.mxu0 }
 0x348   : > { %1622 = vst [vmem:[%s2312_s30] sm:$0xff] %v1621_v46   ;;  %v1015_v50 = vmax.f32 %v989_v47, 0.0  ;;  %v972_v56 = vadd.f32 %v2369_v24, %v971_v48  ;;  %v1216_v46 = vmax.f32 %v1196_v37, 0.0 }
 0x34a   : > { %v1228_v53 = vadd.f32 %v1212_v49, %v1015_v50  ;;  %v1008_v62 = vmax.f32 %v972_v56, 0.0  ;;  %v1180_v50 = vpop.f32.mrf.mxu1 }
 0x34b   : > { %v1181_v55 = vadd.f32 %v2364_v23, %v1180_v50 }
 0x34c   : > { %v1641_v54 = vpack.c.bf16 %v1228_v53, %v1227_v52  ;;  %v1221_v5 = vadd.f32 %v1205_v61, %v1008_v62  ;;  %v1179_v52 = vadd.f32 %v2364_v23, %v1178_v31  ;;  %v1199_v61 = vadd.f32 %v2364_v23, %v1198_v44 }
 0x34d   : > { %v991_v57 = vpop.f32.mrf.mxu2 }
 0x34e   : > { %1661 = vst [vmem:[%s2312_s30 + $0x20] sm:$0xff] %v1641_v54   ;;  %v992_v1 = vadd.f32 %v2369_v24, %v991_v57  ;;  %v1209_v57 = vmax.f32 %v1179_v52, 0.0 }
 0x34f   : > { %v973_v60 = vpop.f32.mrf.mxu0 }
 0x350   : > { %v974_v63 = vadd.f32 %v2369_v24, %v973_v60  ;;  %v1016_v10 = vmax.f32 %v992_v1, 0.0  ;;  %v1200_v60 = vpop.f32.mrf.mxu3 }
 0x352   : > { %v1009_v3 = vmax.f32 %v974_v63, 0.0  ;;  %v1229_v17 = vadd.f32 %v1213_v9, %v1016_v10  ;;  %v1210_v63 = vmax.f32 %v1181_v55, 0.0 }
 0x354   : > { %v1222_v7 = vadd.f32 %v1206_v2, %v1009_v3  ;;  %v1201_v2 = vadd.f32 %v2364_v23, %v1200_v60 }
 0x355   : > { %v993_v8 = vpop.f32.mrf.mxu2 }
 0x356   : > { %v1626_v11 = vpack.c.bf16 %v1222_v7, %v1221_v5  ;;  %v994_v12 = vadd.f32 %v2369_v24, %v993_v8  ;;  %v1217_v5 = vmax.f32 %v1199_v61, 0.0  ;;  %v1218_v9 = vmax.f32 %v1201_v2, 0.0 }
 0x357   : > { %v976_v13 = vpop.f32.mrf.mxu0 }
 0x358   : > { %1658 = vst [vmem:[%s2312_s30 + $0x8] sm:$0xff] %v1626_v11   ;;  %v1017_v16 = vmax.f32 %v994_v12, 0.0  ;;  %v977_v21 = vadd.f32 %v2369_v24, %v976_v13 }
 0x35a   : > { %v1230_v18 = vadd.f32 %v1214_v15, %v1017_v16  ;;  %v1010_v29 = vmax.f32 %v977_v21, 0.0 }
 0x35c   : > { %v1646_v19 = vpack.c.bf16 %v1230_v18, %v1229_v17  ;;  %v1223_v36 = vadd.f32 %v1207_v28, %v1010_v29 }
 0x35d   : > { %v996_v22 = vpop.f32.mrf.mxu2 }
 0x35e   : > { %1662 = vst [vmem:[%s2312_s30 + $0x28] sm:$0xff] %v1646_v19   ;;  %v997_v33 = vadd.f32 %v2369_v24, %v996_v22 }
 0x35f   : > { %v978_v27 = vpop.f32.mrf.mxu0 }
 0x360   : > { %v979_v30 = vadd.f32 %v2369_v24, %v978_v27  ;;  %v1018_v41 = vmax.f32 %v997_v33, 0.0 }
 0x362   : > { %v1011_v35 = vmax.f32 %v979_v30, 0.0  ;;  %v1231_v48 = vadd.f32 %v1215_v40, %v1018_v41 }
 0x364   : > { %v1224_v38 = vadd.f32 %v1208_v34, %v1011_v35 }
 0x365   : > { %v998_v39 = vpop.f32.mrf.mxu2 }
 0x366   : > { %v1631_v42 = vpack.c.bf16 %v1224_v38, %v1223_v36  ;;  %v999_v43 = vadd.f32 %v2369_v24, %v998_v39 }
 0x367   : > { %v981_v45 = vpop.f32.mrf.mxu0 }
 0x368   : > { %1659 = vst [vmem:[%s2312_s30 + $0x10] sm:$0xff] %v1631_v42   ;;  %v1019_v47 = vmax.f32 %v999_v43, 0.0  ;;  %v982_v53 = vadd.f32 %v2369_v24, %v981_v45 }
 0x36a   : > { %v1232_v49 = vadd.f32 %v1216_v46, %v1019_v47  ;;  %v1012_v58 = vmax.f32 %v982_v53, 0.0 }
 0x36c   : > { %v1651_v51 = vpack.c.bf16 %v1232_v49, %v1231_v48  ;;  %v1225_v1 = vadd.f32 %v1209_v57, %v1012_v58 }
 0x36d   : > { %v1001_v54 = vpop.f32.mrf.mxu2 }
 0x36e   : > { %1663 = vst [vmem:[%s2312_s30 + $0x30] sm:$0xff] %v1651_v51   ;;  %v1002_v62 = vadd.f32 %v2369_v24, %v1001_v54 }
 0x36f   : > { %v983_v56 = vpop.f32.mrf.mxu0 }
 0x370   : > { %v984_v59 = vadd.f32 %v2369_v24, %v983_v56  ;;  %v1020_v6 = vmax.f32 %v1002_v62, 0.0 }
 0x372   : > { %v1013_v0 = vmax.f32 %v984_v59, 0.0  ;;  %v1233_v11 = vadd.f32 %v1217_v5, %v1020_v6 }
 0x374   : > { %v1226_v3 = vadd.f32 %v1210_v63, %v1013_v0 }
 0x375   : > { %v1003_v4 = vpop.f32.mrf.mxu2 }
 0x376   : > { %v1636_v7 = vpack.c.bf16 %v1226_v3, %v1225_v1  ;;  %v1004_v8 = vadd.f32 %v2369_v24, %v1003_v4 }
 0x378   : > { %1660 = vst [vmem:[%s2312_s30 + $0x18] sm:$0xff] %v1636_v7   ;;  %v1021_v10 = vmax.f32 %v1004_v8, 0.0 }
 0x37a   : > { %v1234_v12 = vadd.f32 %v1218_v9, %v1021_v10 }
 0x37c   : > { %v1656_v13 = vpack.c.bf16 %v1234_v12, %v1233_v11 }
 0x37e   : > { %1664 = vst [vmem:[%s2312_s30 + $0x38] sm:$0xff] %v1656_v13  }
 0x37f PF: > { %s1617_s8 = sshll.u32 %s2050_s25, 6  ;;  %s2507_s15 = sld [smem:[#allocation30_spill]] }
 0x380   : > { %s1280_s13 = sshll.u32 %s2312_s30, 4  ;;  %s1268_s21 = scalar_lea.sflag [#allocation9], %s2290_s10  ;;  %s1281_s13 = int_to_ptr.vmem [resolvable:$true] %s1280_s13 }
 0x385   : > { %s1279_s26 = scalar_lea.hbm %s2507_s15, %s1617_s8  ;;  %s1962_s25 = scalar_lea.hbm %s2507_s15, 128 }
 0x386   : > { %s1282_s20 = sshll.u32 %s1279_s26, 4  ;;  %s1283_s20 = int_to_ptr.hbm [resolvable:$true] %s1282_s20 }
 0x387   : > { %s1956_s16 = sshra.s32 %s1283_s20, 4  ;;  %s1957_s16 = int_to_ptr.hbm [resolvable:$true] %s1956_s16 }
 0x388   : > { %s1958_s3 = scalar_lea.hbm %s1957_s16, 64  ;;  %p1963_p3 = scmp.lt.s32.totalorder %s1957_s16, %s2507_s15 }
 0x389   : > { %p1959_p12 = scmp.ne.s32.totalorder %s1957_s16, %s1958_s3  ;;  %p1964_p7 = scmp.lt.s32.totalorder %s1962_s25, %s1958_s3 }
 0x38b   : > { %p1960_p13 = pnand %p1959_p12, %p2242_p0  ;;  %p1965_p4 = por %p1964_p7, %p1963_p3 }
 0x38d   : > { %p1961_p2 = pneg %p1960_p13 }
 0x38f   : > { %p1966_p8 = pnand %p1965_p4, %p1961_p2 }
 0x391   : > { %1969 = shalt.err (!%p1966_p8)
}
 0x392   : > { %s2074_s10 = smov 64   ;;  %s2075_s30 = smov 4  }
 0x393   : > { %1715 = dma.vmem_to_hbm [thread:$0]  (%p2242_p0), %s1281_s13, 1024, %s1283_s20, %s1268_s21, %s2074_s10, %s2074_s10, %s2075_s30  }
 0x394 PF: > { %s2508_s17 = sld [smem:[#allocation18_spill]]  ;;  %p1732_p10 = scmp.ge.s32.totalorder %s2062_s28, 2 }
 0x396   : > { %p1725_p5 = pnand %p1732_p10, %p2246_p1 }
 0x398   : > { %p1726_p6 = pneg %p1725_p5 }
 0x39a   : > { %s1297_s19 = sand.u32 1, %s2508_s17  }
 0x39b   : > { %s1298_s29 = scalar_lea.sflag [#allocation9], %s1297_s19 }
 0x39c   : > { %2021 = dma.done.wait (%p1726_p6), %s1298_s29, 1024  }
 0x39d   : > { %2023 = vsyncadd (%p1726_p6), %s1298_s29, 4294966272  ;;  %s40_s28 = sadd.s32 1, %s2062_s28   ;;  %s2510_s8 = sld [smem:[#allocation22_spill]] }
 0x39e   : > { %p37_p9 = scmp.ge.s32.totalorder %s40_s28, 6   ;;  %s2511_s24 = sld [smem:[#allocation19_spill]] }
 0x39f   : > { %s2512_s26 = sld [smem:[#allocation20_spill]]  ;;  %s2514_s21 = smov %s2030_s0 }
 0x3a0   : > { %s2513_s11 = sld [smem:[#allocation21_spill]]  ;;  %s2515_s0 = smov %s2034_s22 }
 0x3a1   : > { %s2517_s1 = smov %s2042_s23  ;;  %s2518_s23 = smov %s2263_s9 }
 0x3a2   : > { %s2519_s25 = smov %s2058_s27  ;;  %39 = sbr.rel (!%p37_p9) target bundleno = 21 (0x15), region = 167 }
 0x3a3   : > { %s2516_s22 = smov %s2510_s8 }
 0x3a6   : > { %s2520_s27 = smov %s2513_s11 }
 0x3a7   :  { %1304 = vsyncpa [#allocation8], 1 }
 0x3a8   :  { %1306 = vsyncpa [#allocation8 + $0x1], 1 }
 0x3a9   :  { %1307 = vsyncpa [#allocation11], 1 }
 0x3aa   :  { %1308 = vsyncpa [#allocation9], 1 }
 0x3ab   :  { %1310 = vsyncpa [#allocation9 + $0x1], 1 }

</bundles_post_ra>
